<compile_context>
chip_gen: v6e
topology: v6e:2x2x1
jax: 0.10.0
libtpu: 0.0.40
codegen_flags: <defaults>
</compile_context>

<pallas_src>
import jax
import jax.numpy as jnp
from jax import lax
from jax.experimental import pallas as pl
from jax.experimental.pallas import tpu as pltpu

KS = (2, 3, 4, 5)          # conv kernel sizes along the sequence axis
N_TAPS = max(KS)           # 5 tap slots; tap i is used by every k > i
LANES = 128
SUB = 8
NEG = -1e30                # additive mask value for invalid positions / lanes


def nlcnn_kernel(ids_ref, tw_ref, mask_ref, bconv_ref, wl_ref, bl_ref, out_ref):
    R = ids_ref.shape[0]                       # block rows = block_b * S_pad
    TB = out_ref.shape[0]                      # block_b
    S = R // TB                                # padded sequence length
    V1 = tw_ref.shape[0]                       # vocab + 1

    # ---- fused embedding+conv: one-hot row-select of TW = embed @ W_packed ----
    ids = ids_ref[...]                                           # (R, 1) int32
    vocab_iota = lax.broadcasted_iota(jnp.int32, (R, V1), 1)
    one_hot = (vocab_iota == ids).astype(jnp.bfloat16)           # exact 0/1 select
    y = jnp.dot(one_hot, tw_ref[...],
                preferred_element_type=jnp.float32)              # (R, 5*128) f32

    # Zero-extend 8 rows so the shifted tap slabs stay in bounds; the extension
    # is only ever read at positions that the -inf mask kills before the max.
    y_ext = jnp.concatenate(
        [y, jnp.zeros((SUB, y.shape[1]), jnp.float32)], axis=0)

    # ---- shared shifted tap slabs: tap i lives in its own 128-lane tile ----
    acc = y_ext[0:R, 0:LANES]
    for i in range(1, N_TAPS):
        acc = acc + y_ext[i:i + R, i * LANES:(i + 1) * LANES]

    # ---- mask invalid positions per kernel size, max-pool over the sequence ----
    acc = acc.reshape(TB, S, LANES) + mask_ref[...]              # additive -1e30 mask
    h = jnp.max(acc, axis=1)                                     # (TB, 128)
    h = jnp.maximum(h + bconv_ref[...], 0.0)                     # bias+ReLU (commute with max)

    # ---- fused final Linear, lane-dense padded output ----
    out = jnp.dot(h.astype(jnp.bfloat16), wl_ref[...],
                  preferred_element_type=jnp.float32) + bl_ref[...]
    out_ref[...] = out                                           # (TB, 128) f32


# ------------------------------- wrapper ------------------------------------

def _round_up(x, m):
    return ((x + m - 1) // m) * m


def _choose_block(B, S_pad, target_rows=1024):
    """Batch block: multiple of 8, ~target_rows MXU rows, >=2 grid steps when possible."""
    bb = max(SUB, (max(1, target_rows // S_pad) // SUB) * SUB)
    b_min = _round_up(B, SUB)
    if bb >= b_min:
        bb = b_min                                   # whole (8-padded) batch, one step
    elif b_min < 2 * bb:
        bb = _round_up((b_min + 1) // 2, SUB)        # split into 2 steps (v7x megacore)
    return bb, _round_up(B, bb)


def _build_position_mask(S_pad, S, C):
    """(1, S_pad, 128) additive mask: 0 where position t is valid for the lane's
    kernel size, -1e30 otherwise (also kills padded positions & dead lanes)."""
    m = jnp.full((S_pad, LANES), NEG, jnp.float32)
    for g, k in enumerate(KS):
        m = m.at[: S - k + 1, g * C:(g + 1) * C].set(0.0)
    return m.reshape(1, S_pad, LANES)


def native_language_cnn_forward(x, kparams, *, target_rows=1024):
    """x: int (B, S) token ids. Returns (B, n_language) float32 logits."""
    B, S = x.shape
    C = kparams['out_channel']
    n_lang = kparams['n_language']
    tw, b_conv, wl, bl = (kparams['tw'], kparams['b_conv'],
                          kparams['wl'], kparams['bl'])
    assert S >= max(KS), "sequence must be at least as long as the largest conv"
    assert 4 * C <= LANES and n_lang <= LANES

    S_pad = _round_up(S, SUB)                        # keep seq sublane-aligned
    bb, B_pad = _choose_block(B, S_pad, target_rows)
    R = bb * S_pad                                   # MXU rows per grid step
    grid = (B_pad // bb,)

    # Padded batch rows / seq positions are garbage; garbage is masked (seq)
    # or sliced off (batch) below.
    ids = jnp.pad(x.astype(jnp.int32), ((0, B_pad - B), (0, S_pad - S)))
    ids = ids.reshape(B_pad * S_pad, 1)              # sublane-major id column
    mask = _build_position_mask(S_pad, S, C)

    out = pl.pallas_call(
        nlcnn_kernel,
        out_shape=jax.ShapeDtypeStruct((B_pad, LANES), jnp.float32),
        grid=grid,
        in_specs=[
            pl.BlockSpec((R, 1), lambda i: (i, 0)),            # token ids
            pl.BlockSpec(tw.shape, lambda i: (0, 0)),          # embed @ conv weights
            pl.BlockSpec(mask.shape, lambda i: (0, 0, 0)),     # position mask
            pl.BlockSpec(b_conv.shape, lambda i: (0, 0)),      # conv biases
            pl.BlockSpec(wl.shape, lambda i: (0, 0)),          # linear weights
            pl.BlockSpec(bl.shape, lambda i: (0, 0)),          # linear bias
        ],
        out_specs=pl.BlockSpec((bb, LANES), lambda i: (i, 0)), # lane-dense logits
        compiler_params=pltpu.CompilerParams(
            dimension_semantics=("parallel",),
            vmem_limit_bytes=32 * 1024 * 1024,                 # safe on v5e/v6e/v7x
        ),
    )(ids, tw, mask, b_conv, wl, bl)
    return out[:B, :n_lang]


# ----------------------------- parameter handling -----------------------------

def init_raw_params(key, vocab_size, embed_dim, out_channel, n_language):
    """PyTorch-layout synthetic parameters matching the nn.Module shapes."""
    keys = jax.random.split(key, 11)
    embed = 0.1 * jax.random.normal(keys[0], (vocab_size + 1, embed_dim), jnp.float32)
    embed = embed.at[vocab_size].set(0.0)              # padding_idx row = 0
    raw = {'embed': embed}
    for idx, k in enumerate(KS):
        raw[f'w{k}'] = 0.1 * jax.random.normal(
            keys[1 + idx], (out_channel, 1, k, embed_dim), jnp.float32)   # Conv2d weight
        raw[f'b{k}'] = 0.1 * jax.random.normal(keys[5 + idx], (out_channel,), jnp.float32)
    raw['wl'] = 0.1 * jax.random.normal(keys[9], (n_language, out_channel * 4), jnp.float32)
    raw['bl'] = 0.1 * jax.random.normal(keys[10], (n_language,), jnp.float32)
    return raw


def pack_params(raw):
    """Pre-pack PyTorch-layout weights into the fused lane-aligned kernel layout."""
    embed = raw['embed'].astype(jnp.float32)           # (V1, E)
    E = embed.shape[1]
    C = raw['b2'].shape[0]
    n_lang = raw['bl'].shape[0]

    # Tap i occupies lanes [i*128, (i+1)*128); within a tile, kernel-size group
    # g (k = KS[g]) owns lanes [g*C, (g+1)*C); zero where tap i >= k.
    wp = jnp.zeros((E, N_TAPS * LANES), jnp.float32)
    for g, k in enumerate(KS):
        w = raw[f'w{k}'][:, 0]                         # (C, k, E)
        for i in range(k):
            col = i * LANES + g * C
            wp = wp.at[:, col:col + C].set(w[:, i, :].T)
    tw = embed @ wp                                    # fold embedding into conv (f32)

    b_conv = jnp.zeros((1, LANES), jnp.float32)
    for g, k in enumerate(KS):
        b_conv = b_conv.at[0, g * C:(g + 1) * C].set(raw[f'b{k}'])

    wl = jnp.zeros((LANES, LANES), jnp.float32).at[:4 * C, :n_lang].set(raw['wl'].T)
    bl = jnp.zeros((1, LANES), jnp.float32).at[0, :n_lang].set(raw['bl'])

    return {
        'tw': tw.astype(jnp.bfloat16),                 # (V1, 5*128) bf16
        'b_conv': b_conv,                              # (1, 128) f32
        'wl': wl.astype(jnp.bfloat16),                 # (128, 128) bf16
        'bl': bl,                                      # (1, 128) f32
        'out_channel': int(C),
        'n_language': int(n_lang),
    }


def reference_forward(x, raw):
    """Pure-JAX f32 reference mirroring the PyTorch module (inference)."""
    emb = raw['embed'][x]                               # (B, S, E)
    S = emb.shape[1]
    feats = []
    for k in KS:
        w = raw[f'w{k}'][:, 0]                          # (C, k, E)
        n = S - k + 1
        windows = jnp.stack([emb[:, t:t + k, :] for t in range(n)], axis=1)  # (B, n, k, E)
        conv = jnp.einsum('bnke,cke->bnc', windows, w) + raw[f'b{k}'][None, None, :]
        feats.append(jnp.max(jax.nn.relu(conv), axis=1))                     # (B, C)
    h = jnp.concatenate(feats, axis=-1)                 # (B, 4C)
    return h @ raw['wl'].T + raw['bl'][None, :]


if __name__ == "__main__":
    vocab_size, embed_dim, dropout_p = 20, 32, 0.5      # dropout = identity at inference
    out_channel, n_language = 8, 4
    B, S = 2, 8

    key = jax.random.PRNGKey(0)
    pkey, xkey = jax.random.split(key)
    raw = init_raw_params(pkey, vocab_size, embed_dim, out_channel, n_language)
    kparams = pack_params(raw)
    # token ids in [0, vocab_size]; vocab_size is the padding index
    x = jax.random.randint(xkey, (B, S), 0, vocab_size + 1, dtype=jnp.int32)

    out = native_language_cnn_forward(x, kparams)
    out = jax.block_until_ready(out)
    assert out.shape == (B, n_language) and out.dtype == jnp.float32

    ref = reference_forward(x, raw)
    assert jnp.allclose(out, ref, rtol=2e-2, atol=2e-2), (out, ref)
    print("KERNEL_OK")
</pallas_src>

<mosaic_0001>
module attributes {stable_mosaic.version = 11 : i64} {
  func.func @nlcnn_kernel(%arg0: i32, %arg1: memref<64x1xi32, #tpu.memory_space<vmem>>, %arg2: memref<21x640xbf16, #tpu.memory_space<vmem>>, %arg3: memref<1x8x128xf32, #tpu.memory_space<vmem>>, %arg4: memref<1x128xf32, #tpu.memory_space<vmem>>, %arg5: memref<128x128xbf16, #tpu.memory_space<vmem>>, %arg6: memref<1x128xf32, #tpu.memory_space<vmem>>, %arg7: memref<8x128xf32, #tpu.memory_space<vmem>>) attributes {dimension_semantics = [#tpu.dimension_semantics<parallel>], iteration_bounds = array<i64: 1>, scalar_prefetch = 0 : i64, scratch_operands = 0 : i64, tpu.core_type = #tpu.core_type<tc>, window_params = [{transform_indices = @transform_0, window_bounds = array<i64: 64, 1>}, {pipeline_mode = #tpu.pipeline_mode<synchronous>, transform_indices = @transform_1, window_bounds = array<i64: 21, 640>}, {pipeline_mode = #tpu.pipeline_mode<synchronous>, transform_indices = @transform_2, window_bounds = array<i64: 1, 8, 128>}, {pipeline_mode = #tpu.pipeline_mode<synchronous>, transform_indices = @transform_3, window_bounds = array<i64: 1, 128>}, {pipeline_mode = #tpu.pipeline_mode<synchronous>, transform_indices = @transform_4, window_bounds = array<i64: 128, 128>}, {pipeline_mode = #tpu.pipeline_mode<synchronous>, transform_indices = @transform_5, window_bounds = array<i64: 1, 128>}, {transform_indices = @transform_6, window_bounds = array<i64: 8, 128>}]} {
    %c0 = arith.constant 0 : index
    %c0_0 = arith.constant 0 : index
    %0 = vector.load %arg1[%c0, %c0_0] : memref<64x1xi32, #tpu.memory_space<vmem>>, vector<64x1xi32>
    %1 = tpu.iota {dimensions = array<i32: 1>} : vector<64x21xi32>
    %2 = vector.broadcast %0 : vector<64x1xi32> to vector<64x21xi32>
    %3 = arith.cmpi eq, %1, %2 : vector<64x21xi32>
    %4 = arith.extui %3 : vector<64x21xi1> to vector<64x21xi32>
    %5 = arith.sitofp %4 : vector<64x21xi32> to vector<64x21xf32>
    %6 = arith.truncf %5 : vector<64x21xf32> to vector<64x21xbf16>
    %c0_1 = arith.constant 0 : index
    %c0_2 = arith.constant 0 : index
    %7 = vector.load %arg2[%c0_1, %c0_2] : memref<21x640xbf16, #tpu.memory_space<vmem>>, vector<21x640xbf16>
    %cst = arith.constant dense<0.000000e+00> : vector<64x640xf32>
    %8 = tpu.matmul %6, %7, %cst {dimension_numbers = #tpu.dot_dimension_numbers<[1], [0], [0], [1], [0, 0, 1, 1], [], []>} : vector<64x21xbf16>, vector<21x640xbf16>, vector<64x640xf32> -> vector<64x640xf32>
    %cst_3 = arith.constant 0.000000e+00 : f32
    %9 = vector.broadcast %cst_3 : f32 to vector<8x640xf32>
    %10 = tpu.concatenate %8, %9 in 0 : vector<64x640xf32>, vector<8x640xf32> -> vector<72x640xf32>
    %11 = vector.extract_strided_slice %10 {offsets = [0, 0], sizes = [64, 128], strides = [1, 1]} : vector<72x640xf32> to vector<64x128xf32>
    %12 = vector.extract_strided_slice %10 {offsets = [1, 128], sizes = [64, 128], strides = [1, 1]} : vector<72x640xf32> to vector<64x128xf32>
    %13 = arith.addf %11, %12 : vector<64x128xf32>
    %14 = vector.extract_strided_slice %10 {offsets = [2, 256], sizes = [64, 128], strides = [1, 1]} : vector<72x640xf32> to vector<64x128xf32>
    %15 = arith.addf %13, %14 : vector<64x128xf32>
    %16 = vector.extract_strided_slice %10 {offsets = [3, 384], sizes = [64, 128], strides = [1, 1]} : vector<72x640xf32> to vector<64x128xf32>
    %17 = arith.addf %15, %16 : vector<64x128xf32>
    %18 = vector.extract_strided_slice %10 {offsets = [4, 512], sizes = [64, 128], strides = [1, 1]} : vector<72x640xf32> to vector<64x128xf32>
    %19 = arith.addf %17, %18 : vector<64x128xf32>
    %20 = vector.shape_cast %19 : vector<64x128xf32> to vector<8x8x128xf32>
    %c0_4 = arith.constant 0 : index
    %c0_5 = arith.constant 0 : index
    %c0_6 = arith.constant 0 : index
    %21 = vector.load %arg3[%c0_4, %c0_5, %c0_6] : memref<1x8x128xf32, #tpu.memory_space<vmem>>, vector<1x8x128xf32>
    %22 = vector.broadcast %21 : vector<1x8x128xf32> to vector<8x8x128xf32>
    %23 = arith.addf %20, %22 : vector<8x8x128xf32>
    %cst_7 = arith.constant dense<0xFF800000> : vector<8x128xf32>
    %24 = vector.multi_reduction <maximumf>, %23, %cst_7 [1] : vector<8x8x128xf32> to vector<8x128xf32>
    %c0_8 = arith.constant 0 : index
    %c0_9 = arith.constant 0 : index
    %25 = vector.load %arg4[%c0_8, %c0_9] : memref<1x128xf32, #tpu.memory_space<vmem>>, vector<1x128xf32>
    %26 = vector.broadcast %25 : vector<1x128xf32> to vector<8x128xf32>
    %27 = arith.addf %24, %26 : vector<8x128xf32>
    %cst_10 = arith.constant 0.000000e+00 : f32
    %28 = vector.broadcast %cst_10 : f32 to vector<8x128xf32>
    %29 = arith.maximumf %27, %28 : vector<8x128xf32>
    %30 = arith.truncf %29 : vector<8x128xf32> to vector<8x128xbf16>
    %c0_11 = arith.constant 0 : index
    %c0_12 = arith.constant 0 : index
    %31 = vector.load %arg5[%c0_11, %c0_12] : memref<128x128xbf16, #tpu.memory_space<vmem>>, vector<128x128xbf16>
    %cst_13 = arith.constant dense<0.000000e+00> : vector<8x128xf32>
    %32 = tpu.matmul %30, %31, %cst_13 {dimension_numbers = #tpu.dot_dimension_numbers<[1], [0], [0], [1], [0, 0, 1, 1], [], []>} : vector<8x128xbf16>, vector<128x128xbf16>, vector<8x128xf32> -> vector<8x128xf32>
    %c0_14 = arith.constant 0 : index
    %c0_15 = arith.constant 0 : index
    %33 = vector.load %arg6[%c0_14, %c0_15] : memref<1x128xf32, #tpu.memory_space<vmem>>, vector<1x128xf32>
    %34 = vector.broadcast %33 : vector<1x128xf32> to vector<8x128xf32>
    %35 = arith.addf %32, %34 : vector<8x128xf32>
    %c0_16 = arith.constant 0 : index
    %c0_17 = arith.constant 0 : index
    %36 = vector.load %arg7[%c0_16, %c0_17] : memref<8x128xf32, #tpu.memory_space<vmem>>, vector<8x128xf32>
    tpu.vector_store %arg7[%c0_16, %c0_17], %35 {strides = array<i32>} : memref<8x128xf32, #tpu.memory_space<vmem>>, vector<8x128xf32>,
    return
  }
  func.func @transform_0(%arg0: i32) -> (i32, i32) {
    %c0_i32 = arith.constant 0 : i32
    %c0_i32_0 = arith.constant 0 : i32
    return %arg0, %c0_i32 : i32, i32
  }
  func.func @transform_1(%arg0: i32) -> (i32, i32) {
    %c0_i32 = arith.constant 0 : i32
    %c0_i32_0 = arith.constant 0 : i32
    %c0_i32_1 = arith.constant 0 : i32
    return %c0_i32, %c0_i32_0 : i32, i32
  }
  func.func @transform_2(%arg0: i32) -> (i32, i32, i32) {
    %c0_i32 = arith.constant 0 : i32
    %c0_i32_0 = arith.constant 0 : i32
    %c0_i32_1 = arith.constant 0 : i32
    %c0_i32_2 = arith.constant 0 : i32
    return %c0_i32, %c0_i32_0, %c0_i32_1 : i32, i32, i32
  }
  func.func @transform_3(%arg0: i32) -> (i32, i32) {
    %c0_i32 = arith.constant 0 : i32
    %c0_i32_0 = arith.constant 0 : i32
    %c0_i32_1 = arith.constant 0 : i32
    return %c0_i32, %c0_i32_0 : i32, i32
  }
  func.func @transform_4(%arg0: i32) -> (i32, i32) {
    %c0_i32 = arith.constant 0 : i32
    %c0_i32_0 = arith.constant 0 : i32
    %c0_i32_1 = arith.constant 0 : i32
    return %c0_i32, %c0_i32_0 : i32, i32
  }
  func.func @transform_5(%arg0: i32) -> (i32, i32) {
    %c0_i32 = arith.constant 0 : i32
    %c0_i32_0 = arith.constant 0 : i32
    %c0_i32_1 = arith.constant 0 : i32
    return %c0_i32, %c0_i32_0 : i32, i32
  }
  func.func @transform_6(%arg0: i32) -> (i32, i32) {
    %c0_i32 = arith.constant 0 : i32
    %c0_i32_0 = arith.constant 0 : i32
    return %arg0, %c0_i32 : i32, i32
  }
}

</mosaic_0001>

<bundles_post_ra>
// kernel: tpu_custom_call.1
= control target key start
LH: loop header
LB: loop body
LE: loop exit
PB: predicated region body
PF: predicated region fallthrough
CT: control target
= control target key end

     0   :  { %11 = vsyncpa [#allocation3], 0  ;;  %s1239_s0 = inlined_call_operand.vmem [shape: s32[64,1], index: 0, kind: input, shape index: {}]   ;;  %s1240_s1 = inlined_call_operand.hbm [shape: bf16[21,640], index: 1, kind: input, shape index: {}]   ;;  %s1241_s2 = inlined_call_operand.vmem [shape: f32[1,8,128], index: 2, kind: input, shape index: {}]   ;;  %s1242_s3 = inlined_call_operand.hbm [shape: f32[1,128], index: 3, kind: input, shape index: {}]   ;;  %s1243_s4 = inlined_call_operand.vmem [shape: bf16[128,128], index: 4, kind: input, shape index: {}]   ;;  %s1244_s5 = inlined_call_operand.vmem [shape: f32[1,128], index: 5, kind: input, shape index: {}]   ;;  %s1245_s6 = inlined_call_operand.hbm [shape: f32[8,128], index: 6, kind: output, shape index: {}]  }
   0x1   :  { %12 = vsyncpa [#allocation6], 0 }
   0x2   :  { %13 = vsyncpa [#allocation4], 0  ;;  %s1012_s21 = smov [#allocation2]  }
   0x3   :  { %s21_s22 = sshll.u32 %s1012_s21, 4  ;;  %s22_s22 = int_to_ptr.vmem [resolvable:$true] %s21_s22 }
   0x4   :  { %s954_s23 = scalar_lea.vmem %s22_s22, 960  ;;  %p959_p1 = scmp.lt.s32.totalorder %s22_s22, %s22_s22 }
   0x5   :  { %p955_p0 = scmp.ne.s32.totalorder %s22_s22, %s954_s23  ;;  %p960_p2 = scmp.lt.s32.totalorder %s954_s23, %s954_s23 }
   0x7   :  { %p961_p3 = por %p960_p2, %p959_p1 }
   0x9   :  { %p962_p4 = pnand %p961_p3, %p955_p0 }
   0xb   :  { %965 = shalt.err (!%p962_p4)
}
   0xc   :  { %s1013_s24 = smov 320   ;;  %s1014_s25 = smov 20  }
   0xd   :  { %27 = dma.hbm_to_vmem [thread:$0]  %s1240_s1, 960, %s22_s22, [#allocation3], %s1013_s24, %s1013_s24, %s1014_s25  }
   0xe   :  { %s1015_s28 = smov [#allocation5]  }
   0xf   :  { %s36_s29 = sshll.u32 %s1015_s28, 4  ;;  %s37_s29 = int_to_ptr.vmem [resolvable:$true] %s36_s29 }
  0x10   :  { %s974_s30 = scalar_lea.vmem %s37_s29, 16  ;;  %s978_s7 = scalar_lea.vmem %s37_s29, 32 }
  0x11   :  { %p975_p5 = scmp.ne.s32.totalorder %s37_s29, %s974_s30  ;;  %p979_p6 = scmp.lt.s32.totalorder %s37_s29, %s37_s29 }
  0x12   :  { %p980_p7 = scmp.lt.s32.totalorder %s978_s7, %s974_s30 }
  0x14   :  { %p981_p8 = por %p980_p7, %p979_p6 }
  0x16   :  { %p982_p9 = pnand %p981_p8, %p975_p5 }
  0x18   :  { %985 = shalt.err (!%p982_p9)
}
  0x19   :  { %39 = dma.hbm_to_vmem [thread:$0]  %s1242_s3, 16, %s37_s29, [#allocation6]  }
  0x1a   :  { %1006 = dma.done.wait [#allocation3], 960  }
  0x1b   :  { %1007 = vsyncadd [#allocation3], 4294966336 }
  0x1c   :  { %1008 = dma.done.wait [#allocation6], 16  }
  0x1d   :  { %1009 = vsyncadd [#allocation6], 4294967280  ;;  %v1016_v0 = vmov 0   ;;  %vm174_vm0 = vcmask 1041408   ;;  %vm175_vm1 = vcmask 1042432   ;;  %v1017_v1 = vmov 65535  }
  0x1e   :  { %925 = vset.pattern.permute.xlu1 %v1016_v0  ;;  %924 = vset.pattern.permute.xlu0 %v1016_v0  ;;  %v176_v2 = vsel %vm174_vm0, 4294967295, %v1017_v1  ;;  %v53_v3 = vld [vmem:[%s1239_s0 + $0x10] sm:$0xff]  ;;  %v51_v4 = vld [vmem:[%s1239_s0] sm:$0xff]  ;;  %v54_v5 = vld [vmem:[%s1239_s0 + $0x18] sm:$0xff]  ;;  %v1018_v28 = vmov 0.0   ;;  %v59_v29 = vlaneseq  ;;  %vm161_vm4 = vcmask 171008  }
  0x1f   :  { %225 = vmatprep.mubr.bf16.mxu0 %v1016_v0  ;;  %298 = vmatprep.mubr.bf16.mxu1 %v1016_v0  ;;  %v52_v6 = vld [vmem:[%s1239_s0 + $0x8] sm:$0xff]  ;;  %v177_v8 = vsel %vm175_vm1, %v176_v2, 0  ;;  %v120_v11 = vld [vmem:[#allocation2 + $0x30] sm:$0x77]  ;;  %v930_v17 = vld [vmem:[#allocation2 + $0x4] ss:$20 sps:$4 sm:$0xff]  }
  0x20   :  { %68 = vperm.xlu1 %925, %v53_v3   ;;  %62 = vperm.xlu0 %924, %v51_v4   ;;  %v119_v7 = vld [vmem:[#allocation2 + $0x28] sm:$0x77]  ;;  %v844_v13 = vcombine.high %v120_v11, %v120_v11  ;;  %v843_v14 = vcombine.low %v120_v11, %v120_v11  ;;  %v55_v19 = vld [vmem:[%s1239_s0 + $0x20] sm:$0xff]  ;;  %v936_v23 = vld [vmem:[#allocation2 + $0x38] ss:$0 sps:$4 sm:$0x77]  }
  0x21   :  { %v842_v9 = vcombine.high %v119_v7, %v119_v7  ;;  %v841_v10 = vcombine.low %v119_v7, %v119_v7  ;;  %v56_v12 = vld [vmem:[%s1239_s0 + $0x28] sm:$0xff]  ;;  %v932_v22 = vld [vmem:[#allocation2] ss:$20 sps:$4 sm:$0xff]   ;;  %v58_v24 = vld [vmem:[%s1239_s0 + $0x38] sm:$0xff]  ;;  %v191_v27 = vand.u32 %v936_v23, %v177_v8  ;;  %v60_v30 = vand.u32 127, %v59_v29  ;;  %s1020_s15 = smov [#allocation7]  }
  0x22   :  { %v933_v18 = vld [vmem:[#allocation2 + $0xc] ss:$20 sps:$4 sm:$0xff]   ;;  %v188_v20 = vand.u32 %v844_v13, %v177_v8  ;;  %v185_v21 = vand.u32 %v843_v14, %v177_v8  ;;  %v57_v25 = vld [vmem:[%s1239_s0 + $0x30] sm:$0xff]  ;;  %v935_v26 = vld [vmem:[#allocation2 + $0x8] ss:$20 sps:$4 sm:$0xff]   ;;  %vm1019_vm11 = vmmov 0  }
  0x23   :  { %v182_v15 = vand.u32 %v842_v9, %v177_v8  ;;  %v179_v16 = vand.u32 %v841_v10, %v177_v8  ;;  %v937_v37 = vld [vmem:[#allocation2 + $0x10] ss:$20 sps:$4 sm:$0xff]   ;;  %v938_v52 = vld [vmem:[%s1243_s4 + $0x38] sm:$0xff]   ;;  %v940_v54 = vld [vmem:[%s1243_s4 + $0x28] sm:$0xff]   ;;  %vm413_vm12 = vcmask 1046528   ;;  %vm455_vm13 = vcmask 1045504  }
  0x24   :  { %71 = vperm.xlu1 %925, %v54_v5   ;;  %65 = vperm.xlu0 %924, %v52_v6   ;;  %v939_v53 = vld [vmem:[%s1243_s4 + $0x30] sm:$0xff]   ;;  %v941_v55 = vld [vmem:[%s1243_s4 + $0x20] sm:$0xff]   ;;  %v942_v56 = vld [vmem:[%s1243_s4 + $0x18] sm:$0xff]   ;;  %vm497_vm14 = vcmask 1044480   ;;  %vm539_vm15 = vcmask 1043456   ;;  %vm701_vm0 = vcmask 1041409  }
  0x25   :  { %205 = vmatprep.subr.bf16.mxu0 %v182_v15  ;;  %278 = vmatprep.subr.bf16.mxu1 %v188_v20  ;;  %v943_v57 = vld [vmem:[%s1243_s4 + $0x10] sm:$0xff]   ;;  %v944_v58 = vld [vmem:[%s1243_s4 + $0x8] sm:$0xff]   ;;  %v945_v59 = vld [vmem:[%s1243_s4] sm:$0xff]   ;;  %vm704_vm1 = vcmask 1042434   ;;  %s818_s16 = sshll.u32 %s1020_s15, 4  ;;  %s819_s16 = int_to_ptr.vmem [resolvable:$true] %s818_s16 }
  0x26   :  { %206 = vmatpush1.bf16.msra.mxu0 %v179_v16  ;;  %279 = vmatpush1.bf16.msra.mxu1 %v185_v21  ;;  %s986_s17 = scalar_lea.vmem %s819_s16, 128  ;;  %p991_p11 = scmp.lt.s32.totalorder %s819_s16, %s819_s16 }
  0x27   :  { %207 = vmatprep.subr.bf16.mxu0 %v930_v17  ;;  %280 = vmatprep.subr.bf16.mxu1 %v933_v18  ;;  %p987_p10 = scmp.ne.s32.totalorder %s819_s16, %s986_s17  ;;  %p992_p12 = scmp.lt.s32.totalorder %s986_s17, %s986_s17 }
  0x28   :  { %77 = vperm.xlu1 %925, %v56_v12   ;;  %74 = vperm.xlu0 %924, %v55_v19  }
  0x29   :  { %p993_p13 = por %p992_p12, %p991_p11 }
  0x2a   :  { %208 = vmatpush1.bf16.msra.mxu0 %v932_v22  ;;  %281 = vmatpush1.bf16.msra.mxu1 %v935_v26 }
  0x2b   :  { %883 = vmatprep.subr.bf16.mxu0 %v191_v27  ;;  %895 = vmatprep.subr.bf16.mxu1 %v1018_v28  ;;  %p994_p0 = pnand %p993_p13, %p987_p10 }
  0x2c   :  { %83 = vperm.xlu1 %925, %v58_v24   ;;  %80 = vperm.xlu0 %924, %v57_v25  }
  0x9b   :  { %v63_v31 = vpop.permute.xlu0 %62  ;;  %v69_v32 = vpop.permute.xlu1 %68 }
  0x9c   :  { %vm85_vm2 = vcmp.eq.s32.totalorder %v60_v30, %v63_v31  ;;  %vm87_vm5 = vcmp.eq.s32.totalorder %v60_v30, %v69_v32 }
  0x9d   :  { %v828_v34 = vsel %vm85_vm2, 1.0, %v1018_v28  ;;  %v830_v39 = vsel %vm87_vm5, 1.0, %v1018_v28  ;;  %vm707_vm2 = vcmask 1043459   ;;  %vm716_vm5 = vcmask 1046534  }
  0x9f   :  { %v66_v33 = vpop.permute.xlu0 %65  ;;  %v72_v38 = vpop.permute.xlu1 %71 }
  0xa0   :  { %vm86_vm3 = vcmp.eq.s32.totalorder %v60_v30, %v66_v33  ;;  %vm88_vm6 = vcmp.eq.s32.totalorder %v60_v30, %v72_v38 }
  0xa1   :  { %v829_v35 = vsel %vm86_vm3, 1.0, %v1018_v28  ;;  %v831_v40 = vsel %vm88_vm6, 1.0, %v1018_v28  ;;  %vm710_vm3 = vcmask 1044484   ;;  %vm719_vm6 = vcmask 1047559  }
  0xa2   :  { %v109_v36 = vpack.c.bf16 %v829_v35, %v828_v34  ;;  %v110_v43 = vpack.c.bf16 %v831_v40, %v830_v39 }
  0xa3   :  { %v78_v41 = vpop.permute.xlu1 %77  ;;  %v75_v42 = vpop.permute.xlu0 %74 }
  0xa4   :  { %846 = vmatmul.mubr.msk.bf16.vlgmr.msra.gmra.mxu0 %vm161_vm4, %v109_v36  ;;  %850 = vmatmul.mubr.msk.bf16.vlgmr.msra.gmra.mxu1 %vm161_vm4, %v109_v36  ;;  %vm90_vm7 = vcmp.eq.s32.totalorder %v60_v30, %v78_v41  ;;  %vm89_vm8 = vcmp.eq.s32.totalorder %v60_v30, %v75_v42 }
  0xa5   :  { %884 = vmatpush3.bf16.msra.mxu0 %v191_v27  ;;  %235 = vmatprep.mubr.bf16.mxu0 %v1016_v0  ;;  %v833_v44 = vsel %vm90_vm7, 1.0, %v1018_v28  ;;  %v832_v45 = vsel %vm89_vm8, 1.0, %v1018_v28 }
  0xa6   :  { %308 = vmatprep.mubr.bf16.mxu1 %v1016_v0  ;;  %885 = vmatprep.subr.bf16.mxu0 %v937_v37  ;;  %v111_v48 = vpack.c.bf16 %v833_v44, %v832_v45 }
  0xa7   :  { %v84_v46 = vpop.permute.xlu1 %83  ;;  %v81_v47 = vpop.permute.xlu0 %80  ;;  %896 = vmatpush3.bf16.msra.mxu1 %v938_v52 }
  0xa8   :  { %vm92_vm9 = vcmp.eq.s32.totalorder %v60_v30, %v84_v46  ;;  %vm91_vm10 = vcmp.eq.s32.totalorder %v60_v30, %v81_v47  ;;  %897 = vmatprep.subr.bf16.mxu1 %v1018_v28  ;;  %v429_v46 = vrot.slane %v1018_v28, 1 }
  0xa9   :  { %886 = vmatpush3.bf16.msra.mxu0 %v937_v37  ;;  %v835_v49 = vsel %vm92_vm9, 1.0, %v1018_v28  ;;  %v834_v50 = vsel %vm91_vm10, 1.0, %v1018_v28 }
  0xaa   :  { %v112_v51 = vpack.c.bf16 %v835_v49, %v834_v50 }
  0xab   :  { %898 = vmatpush3.bf16.msra.mxu1 %v939_v53 }
  0xac   :  { %847 = vmatmul.mubr.msk.bf16.gmra.mxu0 %vm161_vm4, %v110_v43  ;;  %851 = vmatmul.mubr.msk.bf16.gmra.mxu1 %vm161_vm4, %v110_v43 }
  0xad   :  { %245 = vmatprep.mubr.bf16.mxu0 %v1016_v0  ;;  %318 = vmatprep.mubr.bf16.mxu1 %v1016_v0 }
  0xae   :  { %899 = vmatprep.subr.bf16.mxu1 %v1018_v28 }
  0xaf   :  { %900 = vmatpush3.bf16.msra.mxu1 %v940_v54 }
  0xb0   :  { %901 = vmatprep.subr.bf16.mxu1 %v1018_v28 }
  0xb3   :  { %902 = vmatpush3.bf16.msra.mxu1 %v941_v55 }
  0xb4   :  { %848 = vmatmul.mubr.msk.bf16.gmra.mxu0 %vm161_vm4, %v111_v48  ;;  %852 = vmatmul.mubr.msk.bf16.gmra.mxu1 %vm161_vm4, %v111_v48 }
  0xb5   :  { %255 = vmatprep.mubr.bf16.mxu0 %v1016_v0  ;;  %328 = vmatprep.mubr.bf16.mxu1 %v1016_v0 }
  0xb6   :  { %903 = vmatprep.subr.bf16.mxu1 %v1018_v28 }
  0xb7   :  { %904 = vmatpush3.bf16.msra.mxu1 %v942_v56 }
  0xb8   :  { %905 = vmatprep.subr.bf16.mxu1 %v1018_v28 }
  0xbb   :  { %906 = vmatpush3.bf16.msra.mxu1 %v943_v57 }
  0xbc   :  { %849 = vmatmul.mubr.msk.bf16.gmra.mxu0 %vm161_vm4, %v112_v51  ;;  %853 = vmatmul.mubr.msk.bf16.gmra.mxu1 %vm161_vm4, %v112_v51 }
  0xbd   :  { %887 = vmatprep.mubr.msk.bf16.mxu0 %vm161_vm4, %v109_v36  ;;  %907 = vmatprep.subr.bf16.mxu1 %v1018_v28  ;;  %v1176_v36 = vrot.slane %v1018_v28, 2 }
  0xbe   :  { %911 = vmatprep.mubr.msk.bf16.mxu1 %vm1019_vm11, %v1018_v28 }
  0xbf   :  { %908 = vmatpush3.bf16.msra.mxu1 %v944_v58 }
  0xc0   :  { %909 = vmatprep.subr.bf16.mxu1 %v1018_v28 }
  0xc3   :  { %910 = vmatpush3.bf16.msra.mxu1 %v945_v59 }
  0xc4   :  { %888 = vmatmul.mubr.msk.bf16.vlgmr.msra.gmra.mxu0 %vm161_vm4, %v110_v43 }
  0xc5   :  { %891 = vmatprep.mubr.msk.bf16.mxu0 %vm161_vm4, %v111_v48 }
  0xcc   :  { %892 = vmatmul.mubr.msk.bf16.gmra.mxu0 %vm161_vm4, %v112_v51  ;;  %v1187_v51 = vrot.slane %v1018_v28, 3  ;;  %vm713_vm4 = vcmask 1045509  }
 0x164   :  { %v227_v60 = vpop.f32.mrf.mxu0  ;;  %v300_v61 = vpop.f32.mrf.mxu1 }
 0x165   :  { %v456_v34 = vrot.slane %v300_v61, 2 }
 0x166   :  { %v229_v62 = vpop.f32.mrf.mxu0  ;;  %v302_v63 = vpop.f32.mrf.mxu1 }
 0x167   :  { %v414_v17 = vrot.slane %v229_v62, 1  ;;  %v498_v37 = vrot.slane %v302_v63, 3 }
 0x168   :  { %v231_v0 = vpop.f32.mrf.mxu0  ;;  %v304_v1 = vpop.f32.mrf.mxu1 }
 0x169   :  { %v457_v25 = vrot.slane %v304_v1, 2 }
 0x16a   :  { %v233_v2 = vpop.f32.mrf.mxu0  ;;  %v1149_v3 = vpop.f32.mrf.mxu1 }
 0x16b   :  { %v415_v14 = vrot.slane %v233_v2, 1  ;;  %v499_v30 = vrot.slane %v1149_v3, 3  ;;  %v458_v42 = vsel %vm455_vm13, %v456_v34, %v457_v25 }
 0x16c   :  { %v237_v4 = vpop.f32.mrf.mxu0  ;;  %v310_v5 = vpop.f32.mrf.mxu1 }
 0x16d   :  { %v416_v22 = vsel %vm413_vm12, %v414_v17, %v415_v14  ;;  %v459_v35 = vrot.slane %v310_v5, 2  ;;  %v500_v48 = vsel %vm497_vm14, %v498_v37, %v499_v30  ;;  %v1198_v5 = vrot.slane %v1018_v28, 4 }
 0x16e   :  { %v239_v6 = vpop.f32.mrf.mxu0  ;;  %v1151_v7 = vpop.f32.mrf.mxu1  ;;  %v439_v29 = vadd.f32 %v416_v22, %v227_v60 }
 0x16f   :  { %v417_v18 = vrot.slane %v239_v6, 1  ;;  %v501_v49 = vrot.slane %v1151_v7, 3  ;;  %v460_v52 = vsel %vm455_vm13, %v457_v25, %v459_v35 }
 0x170   :  { %v241_v8 = vpop.f32.mrf.mxu0  ;;  %v1153_v9 = vpop.f32.mrf.mxu1  ;;  %v481_v47 = vadd.f32 %v458_v42, %v439_v29 }
 0x171   :  { %v418_v26 = vsel %vm413_vm12, %v415_v14, %v417_v18  ;;  %v461_v39 = vrot.slane %v1153_v9, 2  ;;  %v502_v3 = vsel %vm497_vm14, %v499_v30, %v501_v49 }
 0x172   :  { %v243_v10 = vpop.f32.mrf.mxu0  ;;  %v1155_v11 = vpop.f32.mrf.mxu1  ;;  %v440_v38 = vadd.f32 %v418_v26, %v231_v0  ;;  %v523_v2 = vadd.f32 %v500_v48, %v481_v47 }
 0x173   :  { %v419_v19 = vrot.slane %v243_v10, 1  ;;  %v503_v53 = vrot.slane %v1155_v11, 3  ;;  %v462_v57 = vsel %vm455_vm13, %v459_v35, %v461_v39 }
 0x174   :  { %v1157_v12 = vpop.f32.mrf.mxu0  ;;  %v1159_v13 = vpop.f32.mrf.mxu1  ;;  %v482_v56 = vadd.f32 %v460_v52, %v440_v38 }
 0x175   :  { %v420_v31 = vsel %vm413_vm12, %v417_v18, %v419_v19  ;;  %v463_v54 = vrot.slane %v1159_v13, 2  ;;  %v504_v6 = vsel %vm497_vm14, %v501_v49, %v503_v53 }
 0x176   :  { %v249_v15 = vpop.f32.mrf.mxu0  ;;  %v1161_v16 = vpop.f32.mrf.mxu1  ;;  %v441_v43 = vadd.f32 %v420_v31, %v237_v4 }
 0x177   :  { %v421_v27 = vrot.slane %v249_v15, 1  ;;  %v505_v62 = vrot.slane %v1161_v16, 3  ;;  %v464_v7 = vsel %vm455_vm13, %v461_v39, %v463_v54  ;;  %v524_v16 = vadd.f32 %v502_v3, %v482_v56  ;;  %v573_v39 = vld [vmem:[%s1241_s2] sm:$0xff] }
 0x178   :  { %v1163_v20 = vpop.f32.mrf.mxu0  ;;  %v1165_v21 = vpop.f32.mrf.mxu1  ;;  %v483_v61 = vadd.f32 %v462_v57, %v441_v43 }
 0x179   :  { %v422_v44 = vsel %vm413_vm12, %v419_v19, %v421_v27  ;;  %v465_v63 = vrot.slane %v1165_v21, 2  ;;  %v506_v28 = vsel %vm497_vm14, %v503_v53, %v505_v62 }
 0x17a   :  { %v253_v23 = vpop.f32.mrf.mxu0  ;;  %v1168_v24 = vpop.f32.mrf.mxu1  ;;  %v442_v58 = vadd.f32 %v422_v44, %v241_v8  ;;  %v525_v17 = vadd.f32 %v504_v6, %v483_v61 }
 0x17b   :  { %v423_v40 = vrot.slane %v253_v23, 1  ;;  %v507_v11 = vrot.slane %v1168_v24, 3  ;;  %v466_v18 = vsel %vm455_vm13, %v463_v54, %v465_v63 }
 0x17c   :  { %v257_v32 = vpop.f32.mrf.mxu0  ;;  %v1173_v33 = vpop.f32.mrf.mxu1  ;;  %v484_v10 = vadd.f32 %v464_v7, %v442_v58 }
 0x17d   :  { %v424_v59 = vsel %vm413_vm12, %v421_v27, %v423_v40  ;;  %v467_v13 = vrot.slane %v1173_v33, 2  ;;  %v508_v31 = vsel %vm497_vm14, %v505_v62, %v507_v11 }
 0x17e   :  { %v259_v41 = vpop.f32.mrf.mxu0  ;;  %v1181_v45 = vpop.f32.mrf.mxu1  ;;  %v443_v8 = vadd.f32 %v424_v59, %v1157_v12  ;;  %v526_v30 = vadd.f32 %v506_v28, %v484_v10 }
 0x17f   :  { %v425_v55 = vrot.slane %v259_v41, 1  ;;  %v509_v12 = vrot.slane %v1181_v45, 3  ;;  %v468_v33 = vsel %vm455_vm13, %v465_v63, %v467_v13 }
 0x180   :  { %v261_v50 = vpop.f32.mrf.mxu0  ;;  %v334_v0 = vpop.f32.mrf.mxu1  ;;  %v485_v25 = vadd.f32 %v466_v18, %v443_v8 }
 0x181   :  { %v426_v9 = vsel %vm413_vm12, %v423_v40, %v425_v55  ;;  %v469_v22 = vrot.slane %v334_v0, 2 }
 0x182   :  { %v263_v60 = vpop.f32.mrf.mxu0  ;;  %v336_v19 = vpop.f32.mrf.mxu1  ;;  %v444_v21 = vadd.f32 %v426_v9, %v1163_v20  ;;  %v527_v45 = vadd.f32 %v508_v31, %v485_v25 }
 0x183   :  { %v427_v1 = vrot.slane %v263_v60, 1  ;;  %v511_v34 = vrot.slane %v336_v19, 3  ;;  %v470_v42 = vsel %vm455_vm13, %v467_v13, %v469_v22  ;;  %v472_v49 = vsel %vm455_vm13, %v469_v22, %v1176_v36 }
 0x184   :  { %v889_v4 = vpop.f32.mrf.mxu0  ;;  %v486_v41 = vadd.f32 %v468_v33, %v444_v21  ;;  %v858_v33 = vld [vmem:[#allocation5] ss:$0 sm:$0xff] }
 0x185   :  { %v428_v14 = vsel %vm413_vm12, %v425_v55, %v427_v1  ;;  %v430_v23 = vsel %vm413_vm12, %v427_v1, %v429_v46  ;;  %v543_v27 = vrot.slane %v889_v4, 4  ;;  %v512_v56 = vsel %vm497_vm14, %v509_v12, %v511_v34 }
 0x186   :  { %v373_v15 = vpop.f32.mrf.mxu0  ;;  %v445_v26 = vadd.f32 %v428_v14, %v257_v32  ;;  %v446_v37 = vadd.f32 %v430_v23, %v261_v50  ;;  %v510_v32 = vsel %vm497_vm14, %v507_v11, %v509_v12  ;;  %v514_v57 = vsel %vm497_vm14, %v511_v34, %v1187_v51 }
 0x187   :  { %v540_v38 = vrot.slane %v373_v15, 4  ;;  %v528_v59 = vadd.f32 %v510_v32, %v486_v41 }
 0x188   :  { %v890_v24 = vpop.f32.mrf.mxu0  ;;  %v487_v46 = vadd.f32 %v470_v42, %v445_v26  ;;  %v488_v55 = vadd.f32 %v472_v49, %v446_v37 }
 0x189   :  { %v545_v29 = vrot.slane %v890_v24, 4 }
 0x18a   :  { %v376_v35 = vpop.f32.mrf.mxu0  ;;  %v529_v0 = vadd.f32 %v512_v56, %v487_v46  ;;  %v530_v9 = vadd.f32 %v514_v57, %v488_v55 }
 0x18b   :  { %v546_v20 = vsel %vm539_vm15, %v543_v27, %v545_v29  ;;  %v541_v40 = vrot.slane %v376_v35, 4 }
 0x18c   :  { %v567_v43 = vadd.f32 %v546_v20, %v525_v17  ;;  %v893_v44 = vpop.f32.mrf.mxu0 }
 0x18d   :  { %v542_v47 = vsel %vm539_vm15, %v540_v38, %v541_v40  ;;  %v544_v48 = vsel %vm539_vm15, %v541_v40, %v543_v27  ;;  %v551_v1 = vrot.slane %v893_v44, 4 }
 0x18e   :  { %v576_v50 = vadd.f32 %v573_v39, %v567_v43  ;;  %v565_v52 = vadd.f32 %v542_v47, %v523_v2  ;;  %v566_v53 = vadd.f32 %v544_v48, %v524_v16  ;;  %v389_v54 = vpop.f32.mrf.mxu0 }
 0x18f   :  { %v547_v58 = vrot.slane %v389_v54, 4 }
 0x190   :  { %v594_v60 = vrot.slane %v576_v50, 4  ;;  %v574_v61 = vadd.f32 %v573_v39, %v565_v52  ;;  %v575_v62 = vadd.f32 %v573_v39, %v566_v53  ;;  %v894_v63 = vpop.f32.mrf.mxu0 }
 0x191   :  { %v548_v36 = vsel %vm539_vm15, %v545_v29, %v547_v58  ;;  %v553_v3 = vrot.slane %v894_v63, 4 }
 0x192   :  { %v595_v2 = vmax.f32 %v576_v50, %v594_v60  ;;  %v582_v4 = vrot.slane %v574_v61, 4  ;;  %v588_v6 = vrot.slane %v575_v62, 4  ;;  %v568_v7 = vadd.f32 %v548_v36, %v526_v30  ;;  %v392_v8 = vpop.f32.mrf.mxu0 }
 0x193   :  { %v554_v10 = vsel %vm539_vm15, %v551_v1, %v553_v3  ;;  %v556_v51 = vsel %vm539_vm15, %v553_v3, %v1198_v5  ;;  %v549_v11 = vrot.slane %v392_v8, 4 }
 0x194   :  { %v596_v13 = vrot.slane %v595_v2, 2  ;;  %v583_v14 = vmax.f32 %v574_v61, %v582_v4  ;;  %v589_v15 = vmax.f32 %v575_v62, %v588_v6  ;;  %v577_v16 = vadd.f32 %v573_v39, %v568_v7 }
 0x195   :  { %v571_v17 = vadd.f32 %v554_v10, %v529_v0  ;;  %v572_v28 = vadd.f32 %v556_v51, %v530_v9  ;;  %v550_v18 = vsel %vm539_vm15, %v547_v58, %v549_v11  ;;  %v552_v19 = vsel %vm539_vm15, %v549_v11, %v551_v1 }
 0x196   :  { %v597_v21 = vmax.f32 %v595_v2, %v596_v13  ;;  %v584_v12 = vrot.slane %v583_v14, 2  ;;  %v590_v22 = vrot.slane %v589_v15, 2  ;;  %v600_v23 = vrot.slane %v577_v16, 4 }
 0x197   :  { %v580_v24 = vadd.f32 %v573_v39, %v571_v17  ;;  %v581_v25 = vadd.f32 %v573_v39, %v572_v28  ;;  %v569_v26 = vadd.f32 %v550_v18, %v527_v45  ;;  %v570_v27 = vadd.f32 %v552_v19, %v528_v59 }
 0x198   :  { %v598_v5 = vrot.slane %v597_v21, 1  ;;  %v585_v29 = vmax.f32 %v583_v14, %v584_v12  ;;  %v591_v30 = vmax.f32 %v589_v15, %v590_v22  ;;  %v601_v31 = vmax.f32 %v577_v16, %v600_v23 }
 0x199   :  { %v618_v34 = vrot.slane %v580_v24, 4  ;;  %v624_v35 = vrot.slane %v581_v25, 4  ;;  %v578_v37 = vadd.f32 %v573_v39, %v569_v26  ;;  %v579_v38 = vadd.f32 %v573_v39, %v570_v27 }
 0x19a   :  { %v599_v20 = vmax.f32 %v597_v21, %v598_v5  ;;  %v586_v40 = vrot.slane %v585_v29, 1  ;;  %v592_v41 = vrot.slane %v591_v30, 1  ;;  %v602_v32 = vrot.slane %v601_v31, 2 }
 0x19b   :  { %v619_v42 = vmax.f32 %v580_v24, %v618_v34  ;;  %v625_v43 = vmax.f32 %v581_v25, %v624_v35  ;;  %v606_v44 = vrot.slane %v578_v37, 4  ;;  %v612_v46 = vrot.slane %v579_v38, 4 }
 0x19c   :  { %v639_v47 = vadd.f32 %v858_v33, %v599_v20  ;;  %v587_v45 = vmax.f32 %v585_v29, %v586_v40  ;;  %v593_v48 = vmax.f32 %v591_v30, %v592_v41  ;;  %v603_v49 = vmax.f32 %v601_v31, %v602_v32 }
 0x19d   :  { %v620_v50 = vrot.slane %v619_v42, 2  ;;  %v626_v52 = vrot.slane %v625_v43, 2  ;;  %v607_v53 = vmax.f32 %v578_v37, %v606_v44  ;;  %v613_v54 = vmax.f32 %v579_v38, %v612_v46 }
 0x19e   :  { %v637_v55 = vadd.f32 %v858_v33, %v587_v45  ;;  %v638_v56 = vadd.f32 %v858_v33, %v593_v48  ;;  %v604_v57 = vrot.slane %v603_v49, 1  ;;  %v647_v61 = vmax.f32 %v639_v47, 0.0 }
 0x19f   :  { %v621_v39 = vmax.f32 %v619_v42, %v620_v50  ;;  %v627_v58 = vmax.f32 %v625_v43, %v626_v52  ;;  %v608_v59 = vrot.slane %v607_v53, 2  ;;  %v614_v60 = vrot.slane %v613_v54, 2 }
 0x1a0   :  { %v646_v62 = vmax.f32 %v638_v56, 0.0  ;;  %v605_v63 = vmax.f32 %v603_v49, %v604_v57  ;;  %v645_v2 = vmax.f32 %v637_v55, 0.0  ;;  %v655_v51 = vpack.c.bf16 %v647_v61, %v647_v61 }
 0x1a1   :  { %v622_v0 = vrot.slane %v621_v39, 1  ;;  %v628_v1 = vrot.slane %v627_v58, 1  ;;  %v609_v36 = vmax.f32 %v607_v53, %v608_v59  ;;  %v615_v3 = vmax.f32 %v613_v54, %v614_v60  ;;  %v859_v53 = vld [vmem:[%s1244_s5] ss:$0 sm:$0xff] }
 0x1a2   :  { %v654_v4 = vpack.c.bf16 %v646_v62, %v646_v62  ;;  %v640_v6 = vadd.f32 %v858_v33, %v605_v63  ;;  %v653_v28 = vpack.c.bf16 %v645_v2, %v645_v2  ;;  %v694_v25 = vunpack.c.l.b16 %v655_v51 }
 0x1a3   :  { %v623_v7 = vmax.f32 %v621_v39, %v622_v0  ;;  %v629_v8 = vmax.f32 %v627_v58, %v628_v1  ;;  %v610_v9 = vrot.slane %v609_v36, 1  ;;  %v616_v10 = vrot.slane %v615_v3, 1 }
 0x1a4   :  { %v693_v11 = vunpack.c.l.b16 %v654_v4  ;;  %v648_v13 = vmax.f32 %v640_v6, 0.0  ;;  %v692_v29 = vunpack.c.l.b16 %v653_v28  ;;  %v703_v38 = vrot.slane %v694_v25, 6 }
 0x1a5   :  { %v643_v14 = vadd.f32 %v858_v33, %v623_v7  ;;  %v644_v15 = vadd.f32 %v858_v33, %v629_v8  ;;  %v611_v16 = vmax.f32 %v609_v36, %v610_v9  ;;  %v617_v17 = vmax.f32 %v615_v3, %v616_v10 }
 0x1a6   :  { %v656_v18 = vpack.c.bf16 %v648_v13, %v648_v13  ;;  %v700_v23 = vrot.slane %v693_v11, 7 }
 0x1a7   :  { %v651_v19 = vmax.f32 %v643_v14, 0.0  ;;  %v652_v21 = vmax.f32 %v644_v15, 0.0  ;;  %v641_v12 = vadd.f32 %v858_v33, %v611_v16  ;;  %v642_v22 = vadd.f32 %v858_v33, %v617_v17 }
 0x1a8   :  { %v695_v24 = vunpack.c.l.b16 %v656_v18  ;;  %v702_v35 = vsel %vm701_vm0, %v700_v23, %v692_v29 }
 0x1a9   :  { %v659_v26 = vpack.c.bf16 %v651_v19, %v651_v19  ;;  %v649_v27 = vmax.f32 %v641_v12, 0.0  ;;  %v650_v5 = vmax.f32 %v642_v22, 0.0  ;;  %v660_v30 = vpack.c.bf16 %v652_v21, %v652_v21 }
 0x1aa   :  { %v706_v37 = vrot.slane %v695_v24, 5  ;;  %v705_v43 = vsel %vm704_vm1, %v703_v38, %v702_v35 }
 0x1ab   :  { %v657_v31 = vpack.c.bf16 %v649_v27, %v649_v27  ;;  %v658_v34 = vpack.c.bf16 %v650_v5, %v650_v5  ;;  %v698_v20 = vunpack.c.l.b16 %v659_v26  ;;  %v699_v33 = vunpack.c.l.b16 %v660_v30 }
 0x1ac   :  { %v708_v44 = vsel %vm707_vm2, %v706_v37, %v705_v43 }
 0x1ad   :  { %v696_v40 = vunpack.c.l.b16 %v657_v31  ;;  %v697_v41 = vunpack.c.l.b16 %v658_v34  ;;  %v715_v46 = vrot.slane %v698_v20, 2  ;;  %v718_v48 = vrot.slane %v699_v33, 1 }
 0x1af   :  { %v709_v32 = vrot.slane %v696_v40, 4  ;;  %v712_v42 = vrot.slane %v697_v41, 3 }
 0x1b1   :  { %v711_v47 = vsel %vm710_vm3, %v709_v32, %v708_v44 }
 0x1b2   :  { %v714_v45 = vsel %vm713_vm4, %v712_v42, %v711_v47 }
 0x1b3   :  { %v717_v49 = vsel %vm716_vm5, %v715_v46, %v714_v45 }
 0x1b4   :  { %v720_v50 = vsel %vm719_vm6, %v718_v48, %v717_v49 }
 0x1b5   :  { %v721_v52 = vpack.c.b16 %v720_v50, %v720_v50 }
 0x1b7   :  { %912 = vmatmul.mubr.bf16.vlgmr.msra.gmra.mxu1 %v721_v52 }
 0x277   :  { %v805_v54 = vpop.f32.mrf.mxu1 }
 0x278   :  { %v806_v55 = vadd.f32 %v859_v53, %v805_v54 }
 0x279   :  { %v913_v56 = vpop.f32.mrf.mxu1 }
 0x27a   :  { %811 = vst [vmem:[#allocation7] sm:$0xff] %v806_v55 }
 0x27b   :  { %v808_v57 = vpop.f32.mrf.mxu1 }
 0x27c   :  { %997 = shalt.err (!%p994_p0)
}
 0x27d   :  { %821 = dma.vmem_to_hbm [thread:$0]  %s819_s16, 128, %s1245_s6, [#allocation4]   ;;  %v914_v39 = vpop.f32.mrf.mxu1 }
 0x27e   :  { %1010 = dma.done.wait [#allocation4], 128  }
 0x27f   :  { %1011 = vsyncadd [#allocation4], 4294967168 }
 0x280   :  { %825 = vsyncpa [#allocation3], 1 }
 0x281   :  { %826 = vsyncpa [#allocation6], 1 }
 0x282   :  { %827 = vsyncpa [#allocation4], 1 }

</bundles_post_ra>
